<compile_context>
chip_gen: v7x
topology: tpu7x:2x2x1
jax: 0.10.0
libtpu: 0.0.40
codegen_flags: <defaults>
</compile_context>

<pallas_src>
import functools

import jax
import jax.numpy as jnp
from jax.experimental import pallas as pl
from jax.experimental.pallas import tpu as pltpu


def _round_up(v, m):
    return ((v + m - 1) // m) * m


def _logreg_kernel(x_ref, w_ref, b_ref, o_ref):
    # x_ref: (TB, D) f32/bf16   w_ref: (D, C) bf16   b_ref: (1, C) f32
    # o_ref: (TB, C) f32
    #
    # bf16 operands feed the MXU natively (an f32 x f32 matmul is multi-pass
    # emulated on v5e/v6e/v7x); the accumulate stays f32.
    x = x_ref[...].astype(jnp.bfloat16)
    logits = jnp.dot(x, w_ref[...], preferred_element_type=jnp.float32) + b_ref[...]

    # Numerically stable row-wise softmax in f32.  Exact divide (not the
    # approx EUP reciprocal) so rows sum to 1 to f32 precision.
    m = jnp.max(logits, axis=-1, keepdims=True)
    e = jnp.exp(logits - m)
    s = jnp.sum(e, axis=-1, keepdims=True)
    o_ref[...] = (e / s).astype(o_ref.dtype)


def _pick_batch_tile(B, D, C, requested, vmem_budget_bytes=40 * 1024 * 1024):
    """Largest batch tile (multiple of 8, <= requested) that fits the VMEM budget."""
    tb = min(requested, _round_up(B, 8))
    tb = max(8, _round_up(tb, 8))
    per_row = 2 * (D * 4 + C * 4)            # double-buffered x (<=f32) + out (f32)
    fixed = 2 * (D * C * 2 + C * 4)          # resident W (bf16) + bias (f32)
    while tb > 8 and fixed + tb * per_row > vmem_budget_bytes:
        tb = _round_up(tb // 2, 8)
    return tb


@functools.partial(jax.jit, static_argnames=("batch_tile",))
def logistic_regression_forward(x, weight, bias, *, batch_tile=512):
    """x: (B, D), weight: (C, D) (nn.Linear layout), bias: (C,) -> (B, C) f32 probs."""
    B, D = x.shape
    C = weight.shape[0]

    # One-time transpose/cast of the (small) weight -> canonical MXU orientation.
    w_t = weight.astype(jnp.bfloat16).T            # (D, C)
    b2 = bias.astype(jnp.float32).reshape(1, C)    # (1, C)

    TB = _pick_batch_tile(B, D, C, batch_tile)
    grid = (pl.cdiv(B, TB),)   # no batch padding: partial last block is masked

    # TODO(synk): add a D-tiled ("arbitrary" K grid axis + f32 scratch accumulator)
    # variant for models where the C*D weight no longer fits VMEM next to the tiles.
    return pl.pallas_call(
        _logreg_kernel,
        out_shape=jax.ShapeDtypeStruct((B, C), jnp.float32),
        grid_spec=pltpu.PrefetchScalarGridSpec(
            num_scalar_prefetch=0,
            grid=grid,
            in_specs=[
                # x tile: pipelined / double-buffered over the batch grid axis.
                pl.BlockSpec((TB, D), lambda i: (i, 0)),
                # W and bias: constant index_map -> fetched once, VMEM-resident.
                pl.BlockSpec((D, C), lambda i: (0, 0)),
                pl.BlockSpec((1, C), lambda i: (0, 0)),
            ],
            out_specs=pl.BlockSpec((TB, C), lambda i: (i, 0)),
        ),
        compiler_params=pltpu.CompilerParams(
            # Batch axis is embarrassingly parallel -> both v7x TensorCores usable.
            dimension_semantics=("parallel",),
            # Above the 16/32 MiB scoped defaults, within v7x's 64 MiB physical VMEM.
            vmem_limit_bytes=48 * 1024 * 1024,
        ),
    )(x, w_t, b2)


if __name__ == "__main__":
    key = jax.random.PRNGKey(0)
    kx, kw, kb = jax.random.split(key, 3)

    B = 8             # batch
    input_dim = 32    # features
    num_classes = 4   # classes

    x = jax.random.normal(kx, (B, input_dim), dtype=jnp.float32)
    # Deterministic parameter init (mimics nn.Linear uniform init scale).
    bound = 1.0 / (input_dim ** 0.5)
    weight = jax.random.uniform(kw, (num_classes, input_dim),
                                minval=-bound, maxval=bound, dtype=jnp.float32)
    bias = jax.random.uniform(kb, (num_classes,),
                              minval=-bound, maxval=bound, dtype=jnp.float32)

    out = jax.block_until_ready(logistic_regression_forward(x, weight, bias))

    # References: exact f32, and one matching the kernel's bf16 MXU operands.
    ref_f32 = jax.nn.softmax(x @ weight.T + bias, axis=1)
    ref_bf16 = jax.nn.softmax(
        jnp.dot(x.astype(jnp.bfloat16), weight.astype(jnp.bfloat16).T,
                preferred_element_type=jnp.float32) + bias, axis=1)

    assert out.shape == (B, num_classes)
    assert bool(jnp.allclose(jnp.sum(out, axis=1), 1.0, atol=1e-3))
    assert bool(jnp.allclose(out, ref_bf16, atol=2e-3, rtol=2e-3))
    assert bool(jnp.allclose(out, ref_f32, atol=2e-2, rtol=2e-2))

    print("KERNEL_OK")
</pallas_src>

<mosaic_0001>
module attributes {stable_mosaic.version = 11 : i64} {
  func.func @_logreg_kernel(%arg0: i32, %arg1: memref<8x32xf32, #tpu.memory_space<vmem>>, %arg2: memref<32x4xbf16, #tpu.memory_space<vmem>>, %arg3: memref<1x4xf32, #tpu.memory_space<vmem>>, %arg4: memref<8x4xf32, #tpu.memory_space<vmem>>) attributes {dimension_semantics = [#tpu.dimension_semantics<parallel>], iteration_bounds = array<i64: 1>, scalar_prefetch = 0 : i64, scratch_operands = 0 : i64, tpu.core_type = #tpu.core_type<tc>, window_params = [{transform_indices = @transform_0, window_bounds = array<i64: 8, 32>}, {pipeline_mode = #tpu.pipeline_mode<synchronous>, transform_indices = @transform_1, window_bounds = array<i64: 32, 4>}, {pipeline_mode = #tpu.pipeline_mode<synchronous>, transform_indices = @transform_2, window_bounds = array<i64: 1, 4>}, {transform_indices = @transform_3, window_bounds = array<i64: 8, 4>}]} {
    %c0 = arith.constant 0 : index
    %c0_0 = arith.constant 0 : index
    %0 = vector.load %arg1[%c0, %c0_0] : memref<8x32xf32, #tpu.memory_space<vmem>>, vector<8x32xf32>
    %1 = arith.truncf %0 : vector<8x32xf32> to vector<8x32xbf16>
    %c0_1 = arith.constant 0 : index
    %c0_2 = arith.constant 0 : index
    %2 = vector.load %arg2[%c0_1, %c0_2] : memref<32x4xbf16, #tpu.memory_space<vmem>>, vector<32x4xbf16>
    %cst = arith.constant dense<0.000000e+00> : vector<8x4xf32>
    %3 = tpu.matmul %1, %2, %cst {dimension_numbers = #tpu.dot_dimension_numbers<[1], [0], [0], [1], [0, 0, 1, 1], [], []>} : vector<8x32xbf16>, vector<32x4xbf16>, vector<8x4xf32> -> vector<8x4xf32>
    %c0_3 = arith.constant 0 : index
    %c0_4 = arith.constant 0 : index
    %4 = vector.load %arg3[%c0_3, %c0_4] : memref<1x4xf32, #tpu.memory_space<vmem>>, vector<1x4xf32>
    %5 = vector.broadcast %4 : vector<1x4xf32> to vector<8x4xf32>
    %6 = arith.addf %3, %5 : vector<8x4xf32>
    %cst_5 = arith.constant dense<0xFF800000> : vector<8xf32>
    %7 = vector.multi_reduction <maximumf>, %6, %cst_5 [1] : vector<8x4xf32> to vector<8xf32>
    %8 = vector.shape_cast %7 : vector<8xf32> to vector<8x1xf32>
    %9 = vector.broadcast %8 : vector<8x1xf32> to vector<8x4xf32>
    %10 = arith.subf %6, %9 : vector<8x4xf32>
    %11 = math.exp %10 : vector<8x4xf32>
    %cst_6 = arith.constant dense<0.000000e+00> : vector<8xf32>
    %12 = vector.multi_reduction <add>, %11, %cst_6 [1] : vector<8x4xf32> to vector<8xf32>
    %13 = vector.shape_cast %12 : vector<8xf32> to vector<8x1xf32>
    %14 = vector.broadcast %13 : vector<8x1xf32> to vector<8x4xf32>
    %15 = arith.divf %11, %14 : vector<8x4xf32>
    %c0_7 = arith.constant 0 : index
    %c0_8 = arith.constant 0 : index
    %16 = vector.load %arg4[%c0_7, %c0_8] : memref<8x4xf32, #tpu.memory_space<vmem>>, vector<8x4xf32>
    tpu.vector_store %arg4[%c0_7, %c0_8], %15 {strides = array<i32>} : memref<8x4xf32, #tpu.memory_space<vmem>>, vector<8x4xf32>,
    return
  }
  func.func @transform_0(%arg0: i32) -> (i32, i32) {
    %c0_i32 = arith.constant 0 : i32
    %c0_i32_0 = arith.constant 0 : i32
    return %arg0, %c0_i32 : i32, i32
  }
  func.func @transform_1(%arg0: i32) -> (i32, i32) {
    %c0_i32 = arith.constant 0 : i32
    %c0_i32_0 = arith.constant 0 : i32
    %c0_i32_1 = arith.constant 0 : i32
    return %c0_i32, %c0_i32_0 : i32, i32
  }
  func.func @transform_2(%arg0: i32) -> (i32, i32) {
    %c0_i32 = arith.constant 0 : i32
    %c0_i32_0 = arith.constant 0 : i32
    %c0_i32_1 = arith.constant 0 : i32
    return %c0_i32, %c0_i32_0 : i32, i32
  }
  func.func @transform_3(%arg0: i32) -> (i32, i32) {
    %c0_i32 = arith.constant 0 : i32
    %c0_i32_0 = arith.constant 0 : i32
    return %arg0, %c0_i32 : i32, i32
  }
}

</mosaic_0001>

<bundles_post_ra>
// kernel: logistic_regression_forward.1
= control target key start
LH: loop header
LB: loop body
LE: loop exit
PB: predicated region body
PF: predicated region fallthrough
CT: control target
= control target key end

     0   :  { %v124_v0 = vmov 0.0   ;;  %vm125_vm0 = vmmov 0   ;;  %vm40_vm1 = vcmask 261120   ;;  %vm84_vm2 = vcmask 31744   ;;  %s164_s1 = inlined_call_operand.vmem [shape: bf16[32,4], index: 1, kind: input, shape index: {}]   ;;  %s165_s0 = inlined_call_operand.vmem [shape: f32[8,32], index: 0, kind: input, shape index: {}]   ;;  %s166_s2 = inlined_call_operand.vmem [shape: f32[1,4], index: 2, kind: input, shape index: {}]   ;;  %s167_s3 = inlined_call_operand.vmem [shape: f32[8,4], index: 3, kind: output, shape index: {}]  }
   0x1   :  { %108 = vmatprep.subr.bf16.mxu0 %v124_v0  ;;  %v118_v1 = vld [vmem:[%s164_s1] sm:$0xff]   ;;  %112 = vmatprep.mubr.msk.bf16.mxu0 %vm125_vm0, %v124_v0  ;;  %v119_v2 = vld [vmem:[%s164_s1 + $0x8] sm:$0xff]  }
   0x2   :  { %109 = vmatpush3.bf16.msra.mxu0 %v118_v1  ;;  %v15_v3 = vld [vmem:[%s165_s0] sm:$0xff] }
   0x3   :  { %110 = vmatprep.subr.bf16.mxu0 %v124_v0  ;;  %v16_v4 = vpack.c.bf16 %v15_v3, %v15_v3  ;;  %v101_v5 = vld [vmem:[%s166_s2] ss:$0 sm:$0xff] }
   0x6   :  { %111 = vmatpush3.bf16.msra.mxu0 %v119_v2 }
   0x9   :  { %113 = vmatmul.mubr.msk.bf16.vlgmr.msra.gmra.mrb[0].mxu0 %vm40_vm1, %v16_v4 }
  0xdc   :  { %v78_v6 = vpop.f32.mrb[0].mxu0 }
  0xdd   :  { %v79_v7 = vadd.f32 %v101_v5, %v78_v6  ;;  %v114_v8 = vpop.f32.mrb[1].mxu0 }
  0xde   :  { %v81_v9 = vpop.f32.mrb[2].mxu0 }
  0xdf   :  { %v115_v10 = vpop.f32.mrb[3].mxu0  ;;  %v85_v11 = vsel %vm84_vm2, %v79_v7, -inf }
  0xe0   :  { %86 = vmax.xlane.f32.xlu0 %v85_v11 }
 0x16d   :  { %v87_v12 = vpop.xlane.xlu0 %86 }
 0x16e   :  { %v88_v13 = vsub.f32 %v79_v7, %v87_v12 }
 0x170   :  { %v89_v14 = vmul.f32 1.442695, %v88_v13 }
 0x172   :  { %120 = vpow2.f32 %v89_v14 }
 0x17c   :  { %v121_v15 = vpop.eup %120 }
 0x17d   :  { %v91_v16 = vsel %vm84_vm2, %v121_v15, 0.0 }
 0x17e   :  { %92 = vadd.xlane.f32.xlu0 %v91_v16 }
 0x20b   :  { %v93_v17 = vpop.xlane.xlu0 %92 }
 0x20c   :  { %122 = vrcp.f32 %v93_v17 }
 0x216   :  { %v123_v18 = vpop.eup %122 }
 0x217   :  { %v95_v19 = vmul.f32 %v123_v18, %v121_v15 }
 0x219   :  { %96 = vst.msk [vmem:[%s167_s3] sm:$0xff] %vm84_vm2, %v95_v19 }

</bundles_post_ra>
